<compile_context>
chip_gen: v7x
topology: tpu7x:2x2x1
jax: 0.10.0
libtpu: 0.0.40
codegen_flags: <defaults>
</compile_context>

<pallas_src>
import functools

import numpy as np
import jax
import jax.numpy as jnp
from jax.experimental import pallas as pl
from jax.experimental.pallas import tpu as pltpu


def _round_up(x, m):
    return (x + m - 1) // m * m


def _edge_loss_kernel(x_ref, f1_ref, f2_ref, out_ref, acc_ref, *, B, C, tk, te):
    # x_ref:   (4*B*C, hw_pad) bf16, rows = [out_hi(BC); gt_hi(BC); out_lo(BC); gt_lo(BC)],
    #          resident in VMEM for the whole grid (constant index_map).
    # f1_ref, f2_ref: (1, te) int32 flat endpoint indices for this E tile (-1 in padded cols).
    # out_ref: (B, te) f32 per-(batch, edge) |d_out - d_gt| for this E tile.
    # acc_ref: (4*B*C, te) f32 running endpoint-difference accumulator over K tiles.
    k = pl.program_id(1)
    BC = B * C

    @pl.when(k == 0)
    def _():
        acc_ref[...] = jnp.zeros_like(acc_ref)

    # Build the signed incidence tile on the fly (2 compares + subtract on the VPU).
    # Padded edge columns carry flat index -1 -> never match -> zero column -> contribute 0.
    # Padded K rows have row_ids >= H*W -> never match -> zero row.
    koff = pl.multiple_of(k * tk, tk)
    row_ids = jax.lax.broadcasted_iota(jnp.int32, (tk, te), 0) + koff
    s = ((row_ids == f1_ref[...]).astype(jnp.float32)
         - (row_ids == f2_ref[...]).astype(jnp.float32)).astype(jnp.bfloat16)

    # One native bf16 MXU pass per K tile; 32 live rows per push (hi+lo, out+gt fused).
    acc_ref[...] += jnp.dot(x_ref[:, pl.ds(koff, tk)], s,
                            preferred_element_type=jnp.float32)

    @pl.when(k == pl.num_programs(1) - 1)
    def _():
        acc = acc_ref[...]
        # Recombine the exact bf16 hi/lo halves in f32: d = (x_hi + x_lo) @ S ~= x @ S.
        d = acc[:2 * BC, :] + acc[2 * BC:, :]          # (2*B*C, te): [out rows ; gt rows]
        sq = d * d
        # Static per-batch channel reduction (B, C are small).
        # TODO(synk): for large B replace this unrolled loop with a (B, 2*B*C) 0/1 reduction
        #             matmul on the idle MXU to avoid long epilogue vreg live ranges.
        for b in range(B):
            so = jnp.sum(sq[b * C:(b + 1) * C, :], axis=0, keepdims=True)            # (1, te)
            sg = jnp.sum(sq[BC + b * C:BC + (b + 1) * C, :], axis=0, keepdims=True)  # (1, te)
            out_ref[pl.ds(b, 1), :] = jnp.abs(jnp.sqrt(so) - jnp.sqrt(sg))


def prepare_edges(edges, W, *, te=256):
    """One-time preprocessing of the (constant) edge list -> padded flat endpoint indices.

    Hoisted out of the jitted loss: in the original module `edges` is a fixed constant.
    Returns two (1, e_pad) int32 arrays; padded columns hold -1 (matches no pixel).
    """
    edges = np.asarray(edges, dtype=np.int32)
    E = edges.shape[0]
    e_pad = _round_up(E, te)
    flat1 = edges[:, 0] * W + edges[:, 1]
    flat2 = edges[:, 2] * W + edges[:, 3]
    pad = e_pad - E
    flat1 = np.pad(flat1, (0, pad), constant_values=-1)
    flat2 = np.pad(flat2, (0, pad), constant_values=-1)
    return jnp.asarray(flat1.reshape(1, e_pad)), jnp.asarray(flat2.reshape(1, e_pad))


@functools.partial(jax.jit, static_argnames=("n_edges", "tk", "te"))
def edge_length_loss(uvm_gt, uvm_out, flat1, flat2, *, n_edges, tk=512, te=256):
    """uvm_gt, uvm_out: (B, C, H, W) float32; flat1/flat2: (1, e_pad) int32 from prepare_edges."""
    B, C, H, W = uvm_out.shape
    HW = H * W
    BC = B * C

    e_pad = flat1.shape[-1]
    assert te % 128 == 0 and e_pad % te == 0, "te must be lane-aligned and divide e_pad"
    n_e = e_pad // te

    # K tiling: lane-aligned, clamped to the image size (demo: tk = HW -> n_k == 1).
    tk = min(_round_up(tk, 128), _round_up(HW, 128))
    hw_pad = _round_up(HW, tk)
    n_k = hw_pad // tk

    # Fused LHS: [out ; gt] flattened, split into exact bf16 hi/lo halves and stacked row-wise.
    x = jnp.concatenate([uvm_out.reshape(BC, HW), uvm_gt.reshape(BC, HW)], axis=0)  # (2BC, HW) f32
    x_hi = x.astype(jnp.bfloat16)
    x_lo = (x - x_hi.astype(jnp.float32)).astype(jnp.bfloat16)
    x2 = jnp.concatenate([x_hi, x_lo], axis=0)                                      # (4BC, HW) bf16
    if hw_pad != HW:
        x2 = jnp.pad(x2, ((0, 0), (0, hw_pad - HW)))

    kernel = functools.partial(_edge_loss_kernel, B=B, C=C, tk=tk, te=te)

    per_edge = pl.pallas_call(
        kernel,
        out_shape=jax.ShapeDtypeStruct((B, e_pad), jnp.float32),
        grid=(n_e, n_k),
        in_specs=[
            # Full-array resident block: DMA'd once, reused across every (e, k) step.
            pl.BlockSpec((4 * BC, hw_pad), lambda e, k: (0, 0)),
            pl.BlockSpec((1, te), lambda e, k: (0, e)),
            pl.BlockSpec((1, te), lambda e, k: (0, e)),
        ],
        out_specs=pl.BlockSpec((B, te), lambda e, k: (0, e)),
        scratch_shapes=[pltpu.VMEM((4 * BC, te), jnp.float32)],
        compiler_params=pltpu.CompilerParams(
            dimension_semantics=("parallel", "arbitrary"),
        ),
    )(x2, flat1, flat2)

    # Padded edge columns contributed exactly 0; divide by the true B*E.
    return jnp.sum(per_edge) / (B * n_edges)


def edge_length_loss_ref(uvm_gt, uvm_out, edges):
    """Pure-JAX reference mirroring the PyTorch forward."""
    x1, y1, x2, y2 = edges[:, 0], edges[:, 1], edges[:, 2], edges[:, 3]
    d_out = jnp.sqrt(
        jnp.sum((uvm_out[:, :, x1, y1] - uvm_out[:, :, x2, y2]) ** 2, axis=1, keepdims=True)
    )
    d_gt = jnp.sqrt(
        jnp.sum((uvm_gt[:, :, x1, y1] - uvm_gt[:, :, x2, y2]) ** 2, axis=1, keepdims=True)
    )
    return jnp.mean(jnp.abs(d_out - d_gt))


if __name__ == "__main__":
    B, C, H, W = 2, 4, 16, 16
    E = 300  # not a multiple of the lane tile -> exercises -1 column padding + two E tiles

    key = jax.random.PRNGKey(0)
    k_gt, k_out, kx1, ky1, kx2, ky2 = jax.random.split(key, 6)

    uvm_gt = jax.random.normal(k_gt, (B, C, H, W), dtype=jnp.float32)
    uvm_out = jax.random.normal(k_out, (B, C, H, W), dtype=jnp.float32)

    # Deterministic synthetic edge list [x1, y1, x2, y2]; x coords in [0, H), y in [0, W).
    x1 = jax.random.randint(kx1, (E, 1), 0, H, dtype=jnp.int32)
    y1 = jax.random.randint(ky1, (E, 1), 0, W, dtype=jnp.int32)
    x2 = jax.random.randint(kx2, (E, 1), 0, H, dtype=jnp.int32)
    y2 = jax.random.randint(ky2, (E, 1), 0, W, dtype=jnp.int32)
    edges = jnp.concatenate([x1, y1, x2, y2], axis=1)  # (E, 4) int32

    TE = 256  # multiple of 256 (v6e/v7x MXU width); E=300 -> e_pad=512 -> 2 E tiles for v7x megacore
    flat1, flat2 = prepare_edges(np.asarray(edges), W, te=TE)  # hoisted one-time edge prep

    loss = edge_length_loss(uvm_gt, uvm_out, flat1, flat2, n_edges=E, tk=512, te=TE)
    loss = jax.block_until_ready(loss)

    loss_ref = jax.block_until_ready(edge_length_loss_ref(uvm_gt, uvm_out, edges))

    np.testing.assert_allclose(np.asarray(loss), np.asarray(loss_ref), rtol=1e-4, atol=1e-5)
    print("KERNEL_OK")
</pallas_src>

<mosaic_0001>
module attributes {stable_mosaic.version = 11 : i64} {
  func.func @_edge_loss_kernel(%arg0: i32, %arg1: i32, %arg2: memref<32x256xbf16, #tpu.memory_space<vmem>>, %arg3: memref<1x256xi32, #tpu.memory_space<vmem>>, %arg4: memref<1x256xi32, #tpu.memory_space<vmem>>, %arg5: memref<2x256xf32, #tpu.memory_space<vmem>>, %arg6: memref<32x256xf32, #tpu.memory_space<vmem>>) attributes {dimension_semantics = [#tpu.dimension_semantics<parallel>, #tpu.dimension_semantics<arbitrary>], iteration_bounds = array<i64: 2, 1>, scalar_prefetch = 0 : i64, scratch_operands = 1 : i64, tpu.core_type = #tpu.core_type<tc>, window_params = [{pipeline_mode = #tpu.pipeline_mode<synchronous>, transform_indices = @transform_0, window_bounds = array<i64: 32, 256>}, {transform_indices = @transform_1, window_bounds = array<i64: 1, 256>}, {transform_indices = @transform_2, window_bounds = array<i64: 1, 256>}, {transform_indices = @transform_3, window_bounds = array<i64: 2, 256>}]} {
    %c0_i32 = arith.constant 0 : i32
    %0 = arith.cmpi eq, %arg1, %c0_i32 : i32
    %1 = arith.extui %0 : i1 to i32
    %c0_i32_0 = arith.constant 0 : i32
    %2 = arith.cmpi ne, %1, %c0_i32_0 : i32
    scf.if %2 {
      %cst_11 = arith.constant 0.000000e+00 : f32
      %29 = vector.broadcast %cst_11 : f32 to vector<32x256xf32>
      %c0_12 = arith.constant 0 : index
      %c0_13 = arith.constant 0 : index
      %30 = vector.load %arg6[%c0_12, %c0_13] : memref<32x256xf32, #tpu.memory_space<vmem>>, vector<32x256xf32>
      tpu.vector_store %arg6[%c0_12, %c0_13], %29 {strides = array<i32>} : memref<32x256xf32, #tpu.memory_space<vmem>>, vector<32x256xf32>,
    } else {
    }
    %c256_i32 = arith.constant 256 : i32
    %3 = arith.muli %arg1, %c256_i32 : i32
    %4 = tpu.assume_multiple %3, 256 : i32
    %5 = tpu.iota {dimensions = array<i32: 0>} : vector<256x256xi32>
    %6 = vector.broadcast %4 : i32 to vector<256x256xi32>
    %7 = arith.addi %5, %6 : vector<256x256xi32>
    %c0 = arith.constant 0 : index
    %c0_1 = arith.constant 0 : index
    %8 = vector.load %arg3[%c0, %c0_1] : memref<1x256xi32, #tpu.memory_space<vmem>>, vector<1x256xi32>
    %9 = vector.broadcast %8 : vector<1x256xi32> to vector<256x256xi32>
    %10 = arith.cmpi eq, %7, %9 : vector<256x256xi32>
    %11 = arith.extui %10 : vector<256x256xi1> to vector<256x256xi32>
    %12 = arith.sitofp %11 : vector<256x256xi32> to vector<256x256xf32>
    %c0_2 = arith.constant 0 : index
    %c0_3 = arith.constant 0 : index
    %13 = vector.load %arg4[%c0_2, %c0_3] : memref<1x256xi32, #tpu.memory_space<vmem>>, vector<1x256xi32>
    %14 = vector.broadcast %13 : vector<1x256xi32> to vector<256x256xi32>
    %15 = arith.cmpi eq, %7, %14 : vector<256x256xi32>
    %16 = arith.extui %15 : vector<256x256xi1> to vector<256x256xi32>
    %17 = arith.sitofp %16 : vector<256x256xi32> to vector<256x256xf32>
    %18 = arith.subf %12, %17 : vector<256x256xf32>
    %19 = arith.truncf %18 : vector<256x256xf32> to vector<256x256xbf16>
    %c0_4 = arith.constant 0 : index
    %c0_5 = arith.constant 0 : index
    %20 = vector.load %arg6[%c0_4, %c0_5] : memref<32x256xf32, #tpu.memory_space<vmem>>, vector<32x256xf32>
    %c0_6 = arith.constant 0 : index
    %21 = arith.index_cast %4 : i32 to index
    %22 = vector.load %arg2[%c0_6, %21] : memref<32x256xbf16, #tpu.memory_space<vmem>>, vector<32x256xbf16>
    %cst = arith.constant dense<0.000000e+00> : vector<32x256xf32>
    %23 = tpu.matmul %22, %19, %cst {dimension_numbers = #tpu.dot_dimension_numbers<[1], [0], [0], [1], [0, 0, 1, 1], [], []>} : vector<32x256xbf16>, vector<256x256xbf16>, vector<32x256xf32> -> vector<32x256xf32>
    %24 = arith.addf %20, %23 : vector<32x256xf32>
    %c0_7 = arith.constant 0 : index
    %c0_8 = arith.constant 0 : index
    %25 = vector.load %arg6[%c0_7, %c0_8] : memref<32x256xf32, #tpu.memory_space<vmem>>, vector<32x256xf32>
    tpu.vector_store %arg6[%c0_7, %c0_8], %24 {strides = array<i32>} : memref<32x256xf32, #tpu.memory_space<vmem>>, vector<32x256xf32>,
    %c0_i32_9 = arith.constant 0 : i32
    %26 = arith.cmpi eq, %arg1, %c0_i32_9 : i32
    %27 = arith.extui %26 : i1 to i32
    %c0_i32_10 = arith.constant 0 : i32
    %28 = arith.cmpi ne, %27, %c0_i32_10 : i32
    scf.if %28 {
      %c0_11 = arith.constant 0 : index
      %c0_12 = arith.constant 0 : index
      %29 = vector.load %arg6[%c0_11, %c0_12] : memref<32x256xf32, #tpu.memory_space<vmem>>, vector<32x256xf32>
      %30 = vector.extract_strided_slice %29 {offsets = [0, 0], sizes = [16, 256], strides = [1, 1]} : vector<32x256xf32> to vector<16x256xf32>
      %31 = vector.extract_strided_slice %29 {offsets = [16, 0], sizes = [16, 256], strides = [1, 1]} : vector<32x256xf32> to vector<16x256xf32>
      %32 = arith.addf %30, %31 : vector<16x256xf32>
      %33 = arith.mulf %32, %32 : vector<16x256xf32>
      %34 = vector.extract_strided_slice %33 {offsets = [0, 0], sizes = [4, 256], strides = [1, 1]} : vector<16x256xf32> to vector<4x256xf32>
      %cst_13 = arith.constant dense<0.000000e+00> : vector<256xf32>
      %35 = vector.multi_reduction <add>, %34, %cst_13 [0] : vector<4x256xf32> to vector<256xf32>
      %36 = vector.shape_cast %35 : vector<256xf32> to vector<1x256xf32>
      %37 = vector.extract_strided_slice %33 {offsets = [8, 0], sizes = [4, 256], strides = [1, 1]} : vector<16x256xf32> to vector<4x256xf32>
      %cst_14 = arith.constant dense<0.000000e+00> : vector<256xf32>
      %38 = vector.multi_reduction <add>, %37, %cst_14 [0] : vector<4x256xf32> to vector<256xf32>
      %39 = vector.shape_cast %38 : vector<256xf32> to vector<1x256xf32>
      %40 = math.sqrt %36 : vector<1x256xf32>
      %41 = math.sqrt %39 : vector<1x256xf32>
      %42 = arith.subf %40, %41 : vector<1x256xf32>
      %43 = math.absf %42 : vector<1x256xf32>
      %c0_15 = arith.constant 0 : index
      %c0_16 = arith.constant 0 : index
      %44 = vector.load %arg5[%c0_15, %c0_16] : memref<2x256xf32, #tpu.memory_space<vmem>>, vector<1x256xf32>
      tpu.vector_store %arg5[%c0_15, %c0_16], %43 {strides = array<i32>} : memref<2x256xf32, #tpu.memory_space<vmem>>, vector<1x256xf32>,
      %45 = vector.extract_strided_slice %33 {offsets = [4, 0], sizes = [4, 256], strides = [1, 1]} : vector<16x256xf32> to vector<4x256xf32>
      %cst_17 = arith.constant dense<0.000000e+00> : vector<256xf32>
      %46 = vector.multi_reduction <add>, %45, %cst_17 [0] : vector<4x256xf32> to vector<256xf32>
      %47 = vector.shape_cast %46 : vector<256xf32> to vector<1x256xf32>
      %48 = vector.extract_strided_slice %33 {offsets = [12, 0], sizes = [4, 256], strides = [1, 1]} : vector<16x256xf32> to vector<4x256xf32>
      %cst_18 = arith.constant dense<0.000000e+00> : vector<256xf32>
      %49 = vector.multi_reduction <add>, %48, %cst_18 [0] : vector<4x256xf32> to vector<256xf32>
      %50 = vector.shape_cast %49 : vector<256xf32> to vector<1x256xf32>
      %51 = math.sqrt %47 : vector<1x256xf32>
      %52 = math.sqrt %50 : vector<1x256xf32>
      %53 = arith.subf %51, %52 : vector<1x256xf32>
      %54 = math.absf %53 : vector<1x256xf32>
      %c1 = arith.constant 1 : index
      %c0_19 = arith.constant 0 : index
      %55 = vector.load %arg5[%c1, %c0_19] : memref<2x256xf32, #tpu.memory_space<vmem>>, vector<1x256xf32>
      tpu.vector_store %arg5[%c1, %c0_19], %54 {strides = array<i32>} : memref<2x256xf32, #tpu.memory_space<vmem>>, vector<1x256xf32>,
    } else {
    }
    return
  }
  func.func @transform_0(%arg0: i32, %arg1: i32) -> (i32, i32) {
    %c0_i32 = arith.constant 0 : i32
    %c0_i32_0 = arith.constant 0 : i32
    %c0_i32_1 = arith.constant 0 : i32
    return %c0_i32, %c0_i32_0 : i32, i32
  }
  func.func @transform_1(%arg0: i32, %arg1: i32) -> (i32, i32) {
    %c0_i32 = arith.constant 0 : i32
    %c0_i32_0 = arith.constant 0 : i32
    return %c0_i32, %arg0 : i32, i32
  }
  func.func @transform_2(%arg0: i32, %arg1: i32) -> (i32, i32) {
    %c0_i32 = arith.constant 0 : i32
    %c0_i32_0 = arith.constant 0 : i32
    return %c0_i32, %arg0 : i32, i32
  }
  func.func @transform_3(%arg0: i32, %arg1: i32) -> (i32, i32) {
    %c0_i32 = arith.constant 0 : i32
    %c0_i32_0 = arith.constant 0 : i32
    return %c0_i32, %arg0 : i32, i32
  }
}

</mosaic_0001>

<bundles_post_ra>
// kernel: edge_length_loss.1
= control target key start
LH: loop header
LB: loop body
LE: loop exit
PB: predicated region body
PF: predicated region fallthrough
CT: control target
= control target key end

     0   :  { %s1426_s12 = smov 0   ;;  %s1428_s13 = smov 0   ;;  %s1831_s0 = inlined_call_operand.vmem [shape: bf16[32,256], index: 0, kind: input, shape index: {}]   ;;  %s1832_s1 = inlined_call_operand.vmem [shape: s32[1,512], index: 1, kind: input, shape index: {}]   ;;  %s1833_s2 = inlined_call_operand.vmem [shape: s32[1,512], index: 2, kind: input, shape index: {}]   ;;  %s1834_s3 = inlined_call_operand.vmem [shape: f32[2,512], index: 3, kind: output, shape index: {}]  }
   0x1   :  { %s1430_s14 = smov 0  }
   0x2 LB: > { %s25_s15 = sadd.s32 1, %s1398_s13  ;;  %p1156_p0 = scmp.ge.s32.totalorder %s1402_s14, 1  ;;  %s1402_s14 = sphi %s1430_s14, %s13_s14   ;;  %s1398_s13 = sphi %s1428_s13, %s1836_s13   ;;  %s1394_s12 = sphi %s1426_s12, %s1835_s12  }
   0x3   : > { %p27_p1 = scmp.ge.s32.totalorder %s25_s15, 2  ;;  %p159_p2 = scmp.lt.s32.totalorder %s1402_s14, 3 }
   0x5   : > { %s1838_s15 = smov (%p27_p1, %s25_s15), 0  ;;  %p160_p3 = pnand %p1156_p0, %p159_p2 }
   0x6   : > { %s1157_s16 = sshll.u32 (!%p160_p3), %s1394_s12, 1  ;;  %v215_v0 = vlaneseq (!%p160_p3)  ;;  %v1360_v1 = vld [vmem:[%s1831_s0 + $0x4] ss:$8 sps:$4 sm:$0xff] (!%p160_p3)   ;;  %v1363_v3 = vld [vmem:[%s1831_s0 + $0x14] ss:$8 sps:$4 sm:$0xff] (!%p160_p3)   ;;  %v1404_v17 = vmov (!%p160_p3), 0.0  }
   0x7   : > { %163 = sbr.rel (%p160_p3) target bundleno = 385 (0x181), region = 32  ;;  %p187_p4 = scmp.lt.s32.totalorder (!%p160_p3), %s1157_s16, 3  ;;  %847 = vmatprep.mubr.bf16.mxu0 (!%p160_p3), %v1360_v1  ;;  %857 = vmatprep.mubr.bf16.mxu1 (!%p160_p3), %v1363_v3 }
   0x8   : > { %v1448_v2 = vshrl.u32 (!%p160_p3), %v215_v0, 7 }
   0xa   : > { %v288_v4 = vsub.s32 (!%p160_p3), 1, %v1448_v2  ;;  %v284_v5 = vsub.s32 (!%p160_p3), 0, %v1448_v2  ;;  %v217_v6 = vadd.s32 (!%p160_p3), 8, %v1448_v2  ;;  %v218_v12 = vadd.s32 (!%p160_p3), 16, %v1448_v2 }
   0xb   : > { %v219_v14 = vadd.s32 (!%p160_p3), 24, %v1448_v2  ;;  %v1477_v15 = vadd.s32 (!%p160_p3), 32, %v1448_v2  ;;  %v1480_v16 = vadd.s32 (!%p160_p3), 40, %v1448_v2  ;;  %v222_v40 = vadd.s32 (!%p160_p3), 48, %v1448_v2 }
   0xc   : > { %v223_v48 = vadd.s32 (!%p160_p3), 56, %v1448_v2  ;;  %v224_v56 = vadd.s32 (!%p160_p3), 64, %v1448_v2  ;;  %v225_v1 = vadd.s32 (!%p160_p3), 72, %v1448_v2 }
   0xe   : > { %s1840_s16 = smov (!%p187_p4, %s1157_s16), 3 }
   0xf   : > { %s189_s23 = scalar_lea.vmem %s1832_s1, %s1840_s16  ;;  %s194_s26 = scalar_lea.vmem %s1833_s2, %s1840_s16 }
  0x10   : > { %v281_v7 = vld [vmem:[%s189_s23] sm:$0x3]  ;;  %s1160_s4 = sshll.u32 %s1840_s16, 1 }
  0x11   : > { %v482_v8 = vld [vmem:[%s194_s26] sm:$0x3]  ;;  %v1466_v9 = vrot.slane %v281_v7, %v288_v4  ;;  %v1470_v11 = vrot.slane %v281_v7, %v284_v5  ;;  %s200_s7 = scalar_lea.vmem %s1834_s3, %s1160_s4 }
  0x12   : > { %v1468_v10 = vrot.slane %v482_v8, %v288_v4  ;;  %v1473_v13 = vrot.slane %v482_v8, %v284_v5 }
  0x13   : > { %vm291_vm0 = vcmp.eq.s32.totalorder %v1448_v2, %v1466_v9  ;;  %vm293_vm1 = vcmp.eq.s32.totalorder %v217_v6, %v1466_v9  ;;  %vm290_vm4 = vcmp.eq.s32.totalorder %v1448_v2, %v1470_v11  ;;  %vm292_vm5 = vcmp.eq.s32.totalorder %v217_v6, %v1470_v11 }
  0x14   : > { %vm492_vm2 = vcmp.eq.s32.totalorder %v1448_v2, %v1468_v10  ;;  %vm494_vm3 = vcmp.eq.s32.totalorder %v217_v6, %v1468_v10  ;;  %v1162_v18 = vsel %vm291_vm0, 1.0, %v1404_v17  ;;  %v1164_v19 = vsel %vm293_vm1, 1.0, %v1404_v17 }
  0x15   : > { %v1226_v20 = vsel %vm492_vm2, 1.0, %v1404_v17  ;;  %v1228_v21 = vsel %vm494_vm3, 1.0, %v1404_v17  ;;  %v1161_v24 = vsel %vm290_vm4, 1.0, %v1404_v17  ;;  %v1163_v25 = vsel %vm292_vm5, 1.0, %v1404_v17 }
  0x16   : > { %v684_v22 = vsub.f32 %v1162_v18, %v1226_v20  ;;  %v686_v23 = vsub.f32 %v1164_v19, %v1228_v21  ;;  %vm491_vm6 = vcmp.eq.s32.totalorder %v1448_v2, %v1473_v13  ;;  %vm493_vm7 = vcmp.eq.s32.totalorder %v217_v6, %v1473_v13 }
  0x17   : > { %v1225_v27 = vsel %vm491_vm6, 1.0, %v1404_v17  ;;  %v1227_v28 = vsel %vm493_vm7, 1.0, %v1404_v17  ;;  %vm295_vm8 = vcmp.eq.s32.totalorder %v218_v12, %v1466_v9  ;;  %vm297_vm9 = vcmp.eq.s32.totalorder %v219_v14, %v1466_v9 }
  0x18   : > { %v748_v26 = vpack.c.bf16 %v686_v23, %v684_v22  ;;  %v683_v29 = vsub.f32 %v1161_v24, %v1225_v27  ;;  %v685_v30 = vsub.f32 %v1163_v25, %v1227_v28  ;;  %v1166_v31 = vsel %vm295_vm8, 1.0, %v1404_v17 }
  0x19   : > { %v1168_v32 = vsel %vm297_vm9, 1.0, %v1404_v17  ;;  %vm496_vm10 = vcmp.eq.s32.totalorder %v218_v12, %v1468_v10  ;;  %vm498_vm11 = vcmp.eq.s32.totalorder %v219_v14, %v1468_v10  ;;  %vm294_vm12 = vcmp.eq.s32.totalorder %v218_v12, %v1470_v11 }
  0x1a   : > { %815 = vmatprep.subr.bf16.mxu0 %v748_v26  ;;  %1296 = vmatprep.subr.bf16.mxu1 %v748_v26  ;;  %v747_v33 = vpack.c.bf16 %v685_v30, %v683_v29  ;;  %v1230_v34 = vsel %vm496_vm10, 1.0, %v1404_v17  ;;  %v1232_v35 = vsel %vm498_vm11, 1.0, %v1404_v17  ;;  %vm296_vm13 = vcmp.eq.s32.totalorder %v219_v14, %v1470_v11 }
  0x1b   : > { %v688_v36 = vsub.f32 %v1166_v31, %v1230_v34  ;;  %v690_v37 = vsub.f32 %v1168_v32, %v1232_v35  ;;  %v1165_v38 = vsel %vm294_vm12, 1.0, %v1404_v17  ;;  %v1167_v39 = vsel %vm296_vm13, 1.0, %v1404_v17 }
  0x1c   : > { %816 = vmatpush1.bf16.msra.mxu0 %v747_v33  ;;  %1312 = vmatpush1.bf16.msra.mxu1 %v747_v33  ;;  %vm495_vm14 = vcmp.eq.s32.totalorder %v218_v12, %v1473_v13  ;;  %vm497_vm15 = vcmp.eq.s32.totalorder %v219_v14, %v1473_v13  ;;  %vm299_vm0 = vcmp.eq.s32.totalorder %v1477_v15, %v1466_v9  ;;  %v226_v14 = vadd.s32 80, %v1448_v2 }
  0x1d   : > { %v750_v41 = vpack.c.bf16 %v690_v37, %v688_v36  ;;  %v1229_v42 = vsel %vm495_vm14, 1.0, %v1404_v17  ;;  %v1231_v43 = vsel %vm497_vm15, 1.0, %v1404_v17  ;;  %vm301_vm1 = vcmp.eq.s32.totalorder %v1480_v16, %v1466_v9 }
  0x1e   : > { %v687_v44 = vsub.f32 %v1165_v38, %v1229_v42  ;;  %v689_v45 = vsub.f32 %v1167_v39, %v1231_v43  ;;  %v1170_v46 = vsel %vm299_vm0, 1.0, %v1404_v17  ;;  %v1172_v47 = vsel %vm301_vm1, 1.0, %v1404_v17 }
  0x1f   : > { %817 = vmatprep.subr.bf16.mxu0 %v750_v41  ;;  %1297 = vmatprep.subr.bf16.mxu1 %v750_v41  ;;  %vm500_vm2 = vcmp.eq.s32.totalorder %v1477_v15, %v1468_v10  ;;  %vm502_vm3 = vcmp.eq.s32.totalorder %v1480_v16, %v1468_v10  ;;  %vm298_vm4 = vcmp.eq.s32.totalorder %v1477_v15, %v1470_v11  ;;  %v227_v23 = vadd.s32 88, %v1448_v2 }
  0x20   : > { %v749_v49 = vpack.c.bf16 %v689_v45, %v687_v44  ;;  %v1234_v50 = vsel %vm500_vm2, 1.0, %v1404_v17  ;;  %v1236_v51 = vsel %vm502_vm3, 1.0, %v1404_v17  ;;  %vm300_vm5 = vcmp.eq.s32.totalorder %v1480_v16, %v1470_v11 }
  0x21   : > { %v692_v52 = vsub.f32 %v1170_v46, %v1234_v50  ;;  %v694_v53 = vsub.f32 %v1172_v47, %v1236_v51  ;;  %v1169_v54 = vsel %vm298_vm4, 1.0, %v1404_v17  ;;  %v1171_v55 = vsel %vm300_vm5, 1.0, %v1404_v17 }
  0x22   : > { %818 = vmatpush1.bf16.msra.mxu0 %v749_v49  ;;  %1313 = vmatpush1.bf16.msra.mxu1 %v749_v49  ;;  %vm499_vm6 = vcmp.eq.s32.totalorder %v1477_v15, %v1473_v13  ;;  %vm501_vm7 = vcmp.eq.s32.totalorder %v1480_v16, %v1473_v13  ;;  %vm303_vm8 = vcmp.eq.s32.totalorder %v222_v40, %v1466_v9  ;;  %v228_v31 = vadd.s32 96, %v1448_v2 }
  0x23   : > { %v752_v57 = vpack.c.bf16 %v694_v53, %v692_v52  ;;  %v1233_v58 = vsel %vm499_vm6, 1.0, %v1404_v17  ;;  %v1235_v59 = vsel %vm501_vm7, 1.0, %v1404_v17  ;;  %vm305_vm9 = vcmp.eq.s32.totalorder %v223_v48, %v1466_v9 }
  0x24   : > { %v691_v60 = vsub.f32 %v1169_v54, %v1233_v58  ;;  %v693_v61 = vsub.f32 %v1171_v55, %v1235_v59  ;;  %v1174_v62 = vsel %vm303_vm8, 1.0, %v1404_v17  ;;  %v1176_v63 = vsel %vm305_vm9, 1.0, %v1404_v17 }
  0x25   : > { %819 = vmatprep.subr.bf16.mxu0 %v752_v57  ;;  %1298 = vmatprep.subr.bf16.mxu1 %v752_v57  ;;  %vm504_vm10 = vcmp.eq.s32.totalorder %v222_v40, %v1468_v10  ;;  %vm506_vm11 = vcmp.eq.s32.totalorder %v223_v48, %v1468_v10  ;;  %vm302_vm12 = vcmp.eq.s32.totalorder %v222_v40, %v1470_v11  ;;  %v229_v39 = vadd.s32 104, %v1448_v2 }
  0x26   : > { %v751_v3 = vpack.c.bf16 %v693_v61, %v691_v60  ;;  %v1238_v4 = vsel %vm504_vm10, 1.0, %v1404_v17  ;;  %v1240_v5 = vsel %vm506_vm11, 1.0, %v1404_v17  ;;  %vm304_vm13 = vcmp.eq.s32.totalorder %v223_v48, %v1470_v11 }
  0x27   : > { %v696_v6 = vsub.f32 %v1174_v62, %v1238_v4  ;;  %v698_v7 = vsub.f32 %v1176_v63, %v1240_v5  ;;  %v1173_v8 = vsel %vm302_vm12, 1.0, %v1404_v17  ;;  %v1175_v12 = vsel %vm304_vm13, 1.0, %v1404_v17 }
  0x28   : > { %820 = vmatpush1.bf16.msra.mxu0 %v751_v3  ;;  %1314 = vmatpush1.bf16.msra.mxu1 %v751_v3  ;;  %vm503_vm14 = vcmp.eq.s32.totalorder %v222_v40, %v1473_v13  ;;  %vm505_vm15 = vcmp.eq.s32.totalorder %v223_v48, %v1473_v13  ;;  %vm307_vm0 = vcmp.eq.s32.totalorder %v224_v56, %v1466_v9  ;;  %v230_v47 = vadd.s32 112, %v1448_v2 }
  0x29   : > { %v754_v15 = vpack.c.bf16 %v698_v7, %v696_v6  ;;  %v1237_v16 = vsel %vm503_vm14, 1.0, %v1404_v17  ;;  %v1239_v18 = vsel %vm505_vm15, 1.0, %v1404_v17  ;;  %vm309_vm1 = vcmp.eq.s32.totalorder %v225_v1, %v1466_v9 }
  0x2a   : > { %v695_v19 = vsub.f32 %v1173_v8, %v1237_v16  ;;  %v697_v20 = vsub.f32 %v1175_v12, %v1239_v18  ;;  %v1178_v21 = vsel %vm307_vm0, 1.0, %v1404_v17  ;;  %v1180_v22 = vsel %vm309_vm1, 1.0, %v1404_v17 }
  0x2b   : > { %821 = vmatprep.subr.bf16.mxu0 %v754_v15  ;;  %1299 = vmatprep.subr.bf16.mxu1 %v754_v15  ;;  %vm508_vm2 = vcmp.eq.s32.totalorder %v224_v56, %v1468_v10  ;;  %vm510_vm3 = vcmp.eq.s32.totalorder %v225_v1, %v1468_v10  ;;  %vm306_vm4 = vcmp.eq.s32.totalorder %v224_v56, %v1470_v11  ;;  %v231_v55 = vadd.s32 120, %v1448_v2 }
  0x2c   : > { %v753_v24 = vpack.c.bf16 %v697_v20, %v695_v19  ;;  %v1242_v25 = vsel %vm508_vm2, 1.0, %v1404_v17  ;;  %v1244_v26 = vsel %vm510_vm3, 1.0, %v1404_v17  ;;  %vm308_vm5 = vcmp.eq.s32.totalorder %v225_v1, %v1470_v11 }
  0x2d   : > { %v700_v27 = vsub.f32 %v1178_v21, %v1242_v25  ;;  %v702_v28 = vsub.f32 %v1180_v22, %v1244_v26  ;;  %v1177_v29 = vsel %vm306_vm4, 1.0, %v1404_v17  ;;  %v1179_v30 = vsel %vm308_vm5, 1.0, %v1404_v17 }
  0x2e   : > { %822 = vmatpush1.bf16.msra.mxu0 %v753_v24  ;;  %1315 = vmatpush1.bf16.msra.mxu1 %v753_v24  ;;  %vm507_vm6 = vcmp.eq.s32.totalorder %v224_v56, %v1473_v13  ;;  %vm509_vm7 = vcmp.eq.s32.totalorder %v225_v1, %v1473_v13  ;;  %vm311_vm8 = vcmp.eq.s32.totalorder %v226_v14, %v1466_v9  ;;  %v232_v63 = vadd.s32 128, %v1448_v2 }
  0x2f   : > { %v756_v32 = vpack.c.bf16 %v702_v28, %v700_v27  ;;  %v1241_v33 = vsel %vm507_vm6, 1.0, %v1404_v17  ;;  %v1243_v34 = vsel %vm509_vm7, 1.0, %v1404_v17  ;;  %vm313_vm9 = vcmp.eq.s32.totalorder %v227_v23, %v1466_v9 }
  0x30   : > { %v699_v35 = vsub.f32 %v1177_v29, %v1241_v33  ;;  %v701_v36 = vsub.f32 %v1179_v30, %v1243_v34  ;;  %v1182_v37 = vsel %vm311_vm8, 1.0, %v1404_v17  ;;  %v1184_v38 = vsel %vm313_vm9, 1.0, %v1404_v17 }
  0x31   : > { %823 = vmatprep.subr.bf16.mxu0 %v756_v32  ;;  %1300 = vmatprep.subr.bf16.mxu1 %v756_v32  ;;  %vm512_vm10 = vcmp.eq.s32.totalorder %v226_v14, %v1468_v10  ;;  %vm514_vm11 = vcmp.eq.s32.totalorder %v227_v23, %v1468_v10  ;;  %vm310_vm12 = vcmp.eq.s32.totalorder %v226_v14, %v1470_v11  ;;  %v233_v12 = vadd.s32 136, %v1448_v2 }
  0x32   : > { %v755_v40 = vpack.c.bf16 %v701_v36, %v699_v35  ;;  %v1246_v41 = vsel %vm512_vm10, 1.0, %v1404_v17  ;;  %v1248_v42 = vsel %vm514_vm11, 1.0, %v1404_v17  ;;  %vm312_vm13 = vcmp.eq.s32.totalorder %v227_v23, %v1470_v11 }
  0x33   : > { %v704_v43 = vsub.f32 %v1182_v37, %v1246_v41  ;;  %v706_v44 = vsub.f32 %v1184_v38, %v1248_v42  ;;  %v1181_v45 = vsel %vm310_vm12, 1.0, %v1404_v17  ;;  %v1183_v46 = vsel %vm312_vm13, 1.0, %v1404_v17 }
  0x34   : > { %824 = vmatpush1.bf16.msra.mxu0 %v755_v40  ;;  %1316 = vmatpush1.bf16.msra.mxu1 %v755_v40  ;;  %vm511_vm14 = vcmp.eq.s32.totalorder %v226_v14, %v1473_v13  ;;  %vm513_vm15 = vcmp.eq.s32.totalorder %v227_v23, %v1473_v13  ;;  %vm315_vm0 = vcmp.eq.s32.totalorder %v228_v31, %v1466_v9  ;;  %v234_v22 = vadd.s32 144, %v1448_v2 }
  0x35   : > { %v758_v48 = vpack.c.bf16 %v706_v44, %v704_v43  ;;  %v1245_v49 = vsel %vm511_vm14, 1.0, %v1404_v17  ;;  %v1247_v50 = vsel %vm513_vm15, 1.0, %v1404_v17  ;;  %vm317_vm1 = vcmp.eq.s32.totalorder %v229_v39, %v1466_v9 }
  0x36   : > { %v703_v51 = vsub.f32 %v1181_v45, %v1245_v49  ;;  %v705_v52 = vsub.f32 %v1183_v46, %v1247_v50  ;;  %v1186_v53 = vsel %vm315_vm0, 1.0, %v1404_v17  ;;  %v1188_v54 = vsel %vm317_vm1, 1.0, %v1404_v17 }
  0x37   : > { %825 = vmatprep.subr.bf16.mxu0 %v758_v48  ;;  %1301 = vmatprep.subr.bf16.mxu1 %v758_v48  ;;  %vm516_vm2 = vcmp.eq.s32.totalorder %v228_v31, %v1468_v10  ;;  %vm518_vm3 = vcmp.eq.s32.totalorder %v229_v39, %v1468_v10  ;;  %vm314_vm4 = vcmp.eq.s32.totalorder %v228_v31, %v1470_v11  ;;  %v235_v30 = vadd.s32 152, %v1448_v2 }
  0x38   : > { %v757_v56 = vpack.c.bf16 %v705_v52, %v703_v51  ;;  %v1250_v57 = vsel %vm516_vm2, 1.0, %v1404_v17  ;;  %v1252_v58 = vsel %vm518_vm3, 1.0, %v1404_v17  ;;  %vm316_vm5 = vcmp.eq.s32.totalorder %v229_v39, %v1470_v11 }
  0x39   : > { %v708_v59 = vsub.f32 %v1186_v53, %v1250_v57  ;;  %v710_v60 = vsub.f32 %v1188_v54, %v1252_v58  ;;  %v1185_v61 = vsel %vm314_vm4, 1.0, %v1404_v17  ;;  %v1187_v62 = vsel %vm316_vm5, 1.0, %v1404_v17 }
  0x3a   : > { %826 = vmatpush1.bf16.msra.mxu0 %v757_v56  ;;  %1317 = vmatpush1.bf16.msra.mxu1 %v757_v56  ;;  %vm515_vm6 = vcmp.eq.s32.totalorder %v228_v31, %v1473_v13  ;;  %vm517_vm7 = vcmp.eq.s32.totalorder %v229_v39, %v1473_v13  ;;  %vm319_vm8 = vcmp.eq.s32.totalorder %v230_v47, %v1466_v9  ;;  %v236_v38 = vadd.s32 160, %v1448_v2 }
  0x3b   : > { %v760_v1 = vpack.c.bf16 %v710_v60, %v708_v59  ;;  %v1249_v3 = vsel %vm515_vm6, 1.0, %v1404_v17  ;;  %v1251_v4 = vsel %vm517_vm7, 1.0, %v1404_v17  ;;  %vm321_vm9 = vcmp.eq.s32.totalorder %v231_v55, %v1466_v9 }
  0x3c   : > { %v707_v5 = vsub.f32 %v1185_v61, %v1249_v3  ;;  %v709_v6 = vsub.f32 %v1187_v62, %v1251_v4  ;;  %v1190_v7 = vsel %vm319_vm8, 1.0, %v1404_v17  ;;  %v1192_v8 = vsel %vm321_vm9, 1.0, %v1404_v17 }
  0x3d   : > { %827 = vmatprep.subr.bf16.mxu0 %v760_v1  ;;  %1302 = vmatprep.subr.bf16.mxu1 %v760_v1  ;;  %vm520_vm10 = vcmp.eq.s32.totalorder %v230_v47, %v1468_v10  ;;  %vm522_vm11 = vcmp.eq.s32.totalorder %v231_v55, %v1468_v10  ;;  %vm318_vm12 = vcmp.eq.s32.totalorder %v230_v47, %v1470_v11  ;;  %v237_v46 = vadd.s32 168, %v1448_v2 }
  0x3e   : > { %v759_v14 = vpack.c.bf16 %v709_v6, %v707_v5  ;;  %v1254_v15 = vsel %vm520_vm10, 1.0, %v1404_v17  ;;  %v1256_v16 = vsel %vm522_vm11, 1.0, %v1404_v17  ;;  %vm320_vm13 = vcmp.eq.s32.totalorder %v231_v55, %v1470_v11 }
  0x3f   : > { %v712_v18 = vsub.f32 %v1190_v7, %v1254_v15  ;;  %v714_v19 = vsub.f32 %v1192_v8, %v1256_v16  ;;  %v1189_v20 = vsel %vm318_vm12, 1.0, %v1404_v17  ;;  %v1191_v21 = vsel %vm320_vm13, 1.0, %v1404_v17 }
  0x40   : > { %828 = vmatpush1.bf16.msra.mxu0 %v759_v14  ;;  %1318 = vmatpush1.bf16.msra.mxu1 %v759_v14  ;;  %vm519_vm14 = vcmp.eq.s32.totalorder %v230_v47, %v1473_v13  ;;  %vm521_vm15 = vcmp.eq.s32.totalorder %v231_v55, %v1473_v13  ;;  %vm323_vm0 = vcmp.eq.s32.totalorder %v232_v63, %v1466_v9  ;;  %v238_v54 = vadd.s32 176, %v1448_v2 }
  0x41   : > { %v762_v23 = vpack.c.bf16 %v714_v19, %v712_v18  ;;  %v1253_v24 = vsel %vm519_vm14, 1.0, %v1404_v17  ;;  %v1255_v25 = vsel %vm521_vm15, 1.0, %v1404_v17  ;;  %vm325_vm1 = vcmp.eq.s32.totalorder %v233_v12, %v1466_v9 }
  0x42   : > { %v711_v26 = vsub.f32 %v1189_v20, %v1253_v24  ;;  %v713_v27 = vsub.f32 %v1191_v21, %v1255_v25  ;;  %v1194_v28 = vsel %vm323_vm0, 1.0, %v1404_v17  ;;  %v1196_v29 = vsel %vm325_vm1, 1.0, %v1404_v17 }
  0x43   : > { %829 = vmatprep.subr.bf16.mxu0 %v762_v23  ;;  %1303 = vmatprep.subr.bf16.mxu1 %v762_v23  ;;  %vm524_vm2 = vcmp.eq.s32.totalorder %v232_v63, %v1468_v10  ;;  %vm526_vm3 = vcmp.eq.s32.totalorder %v233_v12, %v1468_v10  ;;  %vm322_vm4 = vcmp.eq.s32.totalorder %v232_v63, %v1470_v11  ;;  %v239_v62 = vadd.s32 184, %v1448_v2 }
  0x44   : > { %v761_v31 = vpack.c.bf16 %v713_v27, %v711_v26  ;;  %v1258_v32 = vsel %vm524_vm2, 1.0, %v1404_v17  ;;  %v1260_v33 = vsel %vm526_vm3, 1.0, %v1404_v17  ;;  %vm324_vm5 = vcmp.eq.s32.totalorder %v233_v12, %v1470_v11 }
  0x45   : > { %v716_v34 = vsub.f32 %v1194_v28, %v1258_v32  ;;  %v718_v35 = vsub.f32 %v1196_v29, %v1260_v33  ;;  %v1193_v36 = vsel %vm322_vm4, 1.0, %v1404_v17  ;;  %v1195_v37 = vsel %vm324_vm5, 1.0, %v1404_v17 }
  0x46   : > { %830 = vmatpush1.bf16.msra.mxu0 %v761_v31  ;;  %1319 = vmatpush1.bf16.msra.mxu1 %v761_v31  ;;  %vm523_vm6 = vcmp.eq.s32.totalorder %v232_v63, %v1473_v13  ;;  %vm525_vm7 = vcmp.eq.s32.totalorder %v233_v12, %v1473_v13  ;;  %vm327_vm8 = vcmp.eq.s32.totalorder %v234_v22, %v1466_v9  ;;  %v240_v8 = vadd.s32 192, %v1448_v2 }
  0x47   : > { %v764_v39 = vpack.c.bf16 %v718_v35, %v716_v34  ;;  %v1257_v40 = vsel %vm523_vm6, 1.0, %v1404_v17  ;;  %v1259_v41 = vsel %vm525_vm7, 1.0, %v1404_v17  ;;  %vm329_vm9 = vcmp.eq.s32.totalorder %v235_v30, %v1466_v9 }
  0x48   : > { %v715_v42 = vsub.f32 %v1193_v36, %v1257_v40  ;;  %v717_v43 = vsub.f32 %v1195_v37, %v1259_v41  ;;  %v1198_v44 = vsel %vm327_vm8, 1.0, %v1404_v17  ;;  %v1200_v45 = vsel %vm329_vm9, 1.0, %v1404_v17 }
  0x49   : > { %831 = vmatprep.subr.bf16.mxu0 %v764_v39  ;;  %1304 = vmatprep.subr.bf16.mxu1 %v764_v39  ;;  %vm528_vm10 = vcmp.eq.s32.totalorder %v234_v22, %v1468_v10  ;;  %vm530_vm11 = vcmp.eq.s32.totalorder %v235_v30, %v1468_v10  ;;  %vm326_vm12 = vcmp.eq.s32.totalorder %v234_v22, %v1470_v11  ;;  %v241_v21 = vadd.s32 200, %v1448_v2 }
  0x4a   : > { %v763_v47 = vpack.c.bf16 %v717_v43, %v715_v42  ;;  %v1262_v48 = vsel %vm528_vm10, 1.0, %v1404_v17  ;;  %v1264_v49 = vsel %vm530_vm11, 1.0, %v1404_v17  ;;  %vm328_vm13 = vcmp.eq.s32.totalorder %v235_v30, %v1470_v11 }
  0x4b   : > { %v720_v50 = vsub.f32 %v1198_v44, %v1262_v48  ;;  %v722_v51 = vsub.f32 %v1200_v45, %v1264_v49  ;;  %v1197_v52 = vsel %vm326_vm12, 1.0, %v1404_v17  ;;  %v1199_v53 = vsel %vm328_vm13, 1.0, %v1404_v17 }
  0x4c   : > { %832 = vmatpush1.bf16.msra.mxu0 %v763_v47  ;;  %1320 = vmatpush1.bf16.msra.mxu1 %v763_v47  ;;  %vm527_vm14 = vcmp.eq.s32.totalorder %v234_v22, %v1473_v13  ;;  %vm529_vm15 = vcmp.eq.s32.totalorder %v235_v30, %v1473_v13  ;;  %vm331_vm0 = vcmp.eq.s32.totalorder %v236_v38, %v1466_v9  ;;  %v242_v29 = vadd.s32 208, %v1448_v2 }
  0x4d   : > { %v766_v55 = vpack.c.bf16 %v722_v51, %v720_v50  ;;  %v1261_v56 = vsel %vm527_vm14, 1.0, %v1404_v17  ;;  %v1263_v57 = vsel %vm529_vm15, 1.0, %v1404_v17  ;;  %vm333_vm1 = vcmp.eq.s32.totalorder %v237_v46, %v1466_v9 }
  0x4e   : > { %v719_v58 = vsub.f32 %v1197_v52, %v1261_v56  ;;  %v721_v59 = vsub.f32 %v1199_v53, %v1263_v57  ;;  %v1202_v60 = vsel %vm331_vm0, 1.0, %v1404_v17  ;;  %v1204_v61 = vsel %vm333_vm1, 1.0, %v1404_v17 }
  0x4f   : > { %833 = vmatprep.subr.bf16.mxu0 %v766_v55  ;;  %1305 = vmatprep.subr.bf16.mxu1 %v766_v55  ;;  %vm532_vm2 = vcmp.eq.s32.totalorder %v236_v38, %v1468_v10  ;;  %vm534_vm3 = vcmp.eq.s32.totalorder %v237_v46, %v1468_v10  ;;  %vm330_vm4 = vcmp.eq.s32.totalorder %v236_v38, %v1470_v11  ;;  %v243_v37 = vadd.s32 216, %v1448_v2 }
  0x50   : > { %v765_v63 = vpack.c.bf16 %v721_v59, %v719_v58  ;;  %v1266_v1 = vsel %vm532_vm2, 1.0, %v1404_v17  ;;  %v1268_v3 = vsel %vm534_vm3, 1.0, %v1404_v17  ;;  %vm332_vm5 = vcmp.eq.s32.totalorder %v237_v46, %v1470_v11 }
  0x51   : > { %v724_v4 = vsub.f32 %v1202_v60, %v1266_v1  ;;  %v726_v5 = vsub.f32 %v1204_v61, %v1268_v3  ;;  %v1201_v6 = vsel %vm330_vm4, 1.0, %v1404_v17  ;;  %v1203_v7 = vsel %vm332_vm5, 1.0, %v1404_v17 }
  0x52   : > { %834 = vmatpush1.bf16.msra.mxu0 %v765_v63  ;;  %1321 = vmatpush1.bf16.msra.mxu1 %v765_v63  ;;  %vm531_vm6 = vcmp.eq.s32.totalorder %v236_v38, %v1473_v13  ;;  %vm533_vm7 = vcmp.eq.s32.totalorder %v237_v46, %v1473_v13  ;;  %vm335_vm8 = vcmp.eq.s32.totalorder %v238_v54, %v1466_v9  ;;  %v244_v45 = vadd.s32 224, %v1448_v2 }
  0x53   : > { %v768_v12 = vpack.c.bf16 %v726_v5, %v724_v4  ;;  %v1265_v14 = vsel %vm531_vm6, 1.0, %v1404_v17  ;;  %v1267_v15 = vsel %vm533_vm7, 1.0, %v1404_v17  ;;  %vm337_vm9 = vcmp.eq.s32.totalorder %v239_v62, %v1466_v9 }
  0x54   : > { %v723_v16 = vsub.f32 %v1201_v6, %v1265_v14  ;;  %v725_v18 = vsub.f32 %v1203_v7, %v1267_v15  ;;  %v1206_v19 = vsel %vm335_vm8, 1.0, %v1404_v17  ;;  %v1208_v20 = vsel %vm337_vm9, 1.0, %v1404_v17 }
  0x55   : > { %835 = vmatprep.subr.bf16.mxu0 %v768_v12  ;;  %1306 = vmatprep.subr.bf16.mxu1 %v768_v12  ;;  %vm536_vm10 = vcmp.eq.s32.totalorder %v238_v54, %v1468_v10  ;;  %vm538_vm11 = vcmp.eq.s32.totalorder %v239_v62, %v1468_v10  ;;  %vm334_vm12 = vcmp.eq.s32.totalorder %v238_v54, %v1470_v11  ;;  %v245_v53 = vadd.s32 232, %v1448_v2 }
  0x56   : > { %v767_v22 = vpack.c.bf16 %v725_v18, %v723_v16  ;;  %v1270_v23 = vsel %vm536_vm10, 1.0, %v1404_v17  ;;  %v1272_v24 = vsel %vm538_vm11, 1.0, %v1404_v17  ;;  %vm336_vm13 = vcmp.eq.s32.totalorder %v239_v62, %v1470_v11 }
  0x57   : > { %v728_v25 = vsub.f32 %v1206_v19, %v1270_v23  ;;  %v730_v26 = vsub.f32 %v1208_v20, %v1272_v24  ;;  %v1205_v27 = vsel %vm334_vm12, 1.0, %v1404_v17  ;;  %v1207_v28 = vsel %vm336_vm13, 1.0, %v1404_v17 }
  0x58   : > { %836 = vmatpush1.bf16.msra.mxu0 %v767_v22  ;;  %1322 = vmatpush1.bf16.msra.mxu1 %v767_v22  ;;  %vm535_vm14 = vcmp.eq.s32.totalorder %v238_v54, %v1473_v13  ;;  %vm537_vm15 = vcmp.eq.s32.totalorder %v239_v62, %v1473_v13  ;;  %vm339_vm0 = vcmp.eq.s32.totalorder %v240_v8, %v1466_v9  ;;  %v246_v61 = vadd.s32 240, %v1448_v2 }
  0x59   : > { %v770_v30 = vpack.c.bf16 %v730_v26, %v728_v25  ;;  %v1269_v31 = vsel %vm535_vm14, 1.0, %v1404_v17  ;;  %v1271_v32 = vsel %vm537_vm15, 1.0, %v1404_v17  ;;  %vm341_vm1 = vcmp.eq.s32.totalorder %v241_v21, %v1466_v9 }
  0x5a   : > { %v727_v33 = vsub.f32 %v1205_v27, %v1269_v31  ;;  %v729_v34 = vsub.f32 %v1207_v28, %v1271_v32  ;;  %v1210_v35 = vsel %vm339_vm0, 1.0, %v1404_v17  ;;  %v1212_v36 = vsel %vm341_vm1, 1.0, %v1404_v17 }
  0x5b   : > { %837 = vmatprep.subr.bf16.mxu0 %v770_v30  ;;  %1307 = vmatprep.subr.bf16.mxu1 %v770_v30  ;;  %vm540_vm2 = vcmp.eq.s32.totalorder %v240_v8, %v1468_v10  ;;  %vm542_vm3 = vcmp.eq.s32.totalorder %v241_v21, %v1468_v10  ;;  %vm338_vm4 = vcmp.eq.s32.totalorder %v240_v8, %v1470_v11  ;;  %v247_v7 = vadd.s32 248, %v1448_v2 }
  0x5c   : > { %v769_v38 = vpack.c.bf16 %v729_v34, %v727_v33  ;;  %v1274_v39 = vsel %vm540_vm2, 1.0, %v1404_v17  ;;  %v1276_v40 = vsel %vm542_vm3, 1.0, %v1404_v17  ;;  %vm340_vm5 = vcmp.eq.s32.totalorder %v241_v21, %v1470_v11 }
  0x5d   : > { %v732_v41 = vsub.f32 %v1210_v35, %v1274_v39  ;;  %v734_v42 = vsub.f32 %v1212_v36, %v1276_v40  ;;  %v1209_v43 = vsel %vm338_vm4, 1.0, %v1404_v17  ;;  %v1211_v44 = vsel %vm340_vm5, 1.0, %v1404_v17 }
  0x5e   : > { %838 = vmatpush1.bf16.msra.mxu0 %v769_v38  ;;  %1323 = vmatpush1.bf16.msra.mxu1 %v769_v38  ;;  %vm539_vm6 = vcmp.eq.s32.totalorder %v240_v8, %v1473_v13  ;;  %vm541_vm7 = vcmp.eq.s32.totalorder %v241_v21, %v1473_v13  ;;  %vm343_vm8 = vcmp.eq.s32.totalorder %v242_v29, %v1466_v9  ;;  %v1361_v38 = vld [vmem:[%s1831_s0 + $0x10] ss:$8 sps:$4 sm:$0xff]  }
  0x5f   : > { %v772_v46 = vpack.c.bf16 %v734_v42, %v732_v41  ;;  %v1273_v47 = vsel %vm539_vm6, 1.0, %v1404_v17  ;;  %v1275_v48 = vsel %vm541_vm7, 1.0, %v1404_v17  ;;  %vm345_vm9 = vcmp.eq.s32.totalorder %v243_v37, %v1466_v9 }
  0x60   : > { %v731_v49 = vsub.f32 %v1209_v43, %v1273_v47  ;;  %v733_v50 = vsub.f32 %v1211_v44, %v1275_v48  ;;  %v1214_v51 = vsel %vm343_vm8, 1.0, %v1404_v17  ;;  %v1216_v52 = vsel %vm345_vm9, 1.0, %v1404_v17 }
  0x61   : > { %839 = vmatprep.subr.bf16.mxu0 %v772_v46  ;;  %1308 = vmatprep.subr.bf16.mxu1 %v772_v46  ;;  %vm544_vm10 = vcmp.eq.s32.totalorder %v242_v29, %v1468_v10  ;;  %vm546_vm11 = vcmp.eq.s32.totalorder %v243_v37, %v1468_v10  ;;  %vm342_vm12 = vcmp.eq.s32.totalorder %v242_v29, %v1470_v11 }
  0x62   : > { %v771_v54 = vpack.c.bf16 %v733_v50, %v731_v49  ;;  %v1278_v55 = vsel %vm544_vm10, 1.0, %v1404_v17  ;;  %v1280_v56 = vsel %vm546_vm11, 1.0, %v1404_v17  ;;  %vm344_vm13 = vcmp.eq.s32.totalorder %v243_v37, %v1470_v11 }
  0x63   : > { %v736_v57 = vsub.f32 %v1214_v51, %v1278_v55  ;;  %v738_v58 = vsub.f32 %v1216_v52, %v1280_v56  ;;  %v1213_v59 = vsel %vm342_vm12, 1.0, %v1404_v17  ;;  %v1215_v60 = vsel %vm344_vm13, 1.0, %v1404_v17 }
  0x64   : > { %840 = vmatpush1.bf16.msra.mxu0 %v771_v54  ;;  %1324 = vmatpush1.bf16.msra.mxu1 %v771_v54  ;;  %vm543_vm14 = vcmp.eq.s32.totalorder %v242_v29, %v1473_v13  ;;  %vm545_vm15 = vcmp.eq.s32.totalorder %v243_v37, %v1473_v13  ;;  %vm347_vm0 = vcmp.eq.s32.totalorder %v244_v45, %v1466_v9  ;;  %v1358_v37 = vld [vmem:[%s1831_s0] ss:$8 sps:$4 sm:$0xff]  }
  0x65   : > { %v774_v62 = vpack.c.bf16 %v738_v58, %v736_v57  ;;  %v1277_v63 = vsel %vm543_vm14, 1.0, %v1404_v17  ;;  %v1279_v1 = vsel %vm545_vm15, 1.0, %v1404_v17  ;;  %vm349_vm1 = vcmp.eq.s32.totalorder %v245_v53, %v1466_v9 }
  0x66   : > { %v735_v3 = vsub.f32 %v1213_v59, %v1277_v63  ;;  %v737_v4 = vsub.f32 %v1215_v60, %v1279_v1  ;;  %v1218_v5 = vsel %vm347_vm0, 1.0, %v1404_v17  ;;  %v1220_v6 = vsel %vm349_vm1, 1.0, %v1404_v17 }
  0x67   : > { %841 = vmatprep.subr.bf16.mxu0 %v774_v62  ;;  %1309 = vmatprep.subr.bf16.mxu1 %v774_v62  ;;  %vm548_vm2 = vcmp.eq.s32.totalorder %v244_v45, %v1468_v10  ;;  %vm550_vm3 = vcmp.eq.s32.totalorder %v245_v53, %v1468_v10  ;;  %vm346_vm4 = vcmp.eq.s32.totalorder %v244_v45, %v1470_v11  ;;  %vm903_vm0 = vcmask 1043456  }
  0x68   : > { %v773_v8 = vpack.c.bf16 %v737_v4, %v735_v3  ;;  %v1282_v12 = vsel %vm548_vm2, 1.0, %v1404_v17  ;;  %v1284_v14 = vsel %vm550_vm3, 1.0, %v1404_v17  ;;  %vm348_vm5 = vcmp.eq.s32.totalorder %v245_v53, %v1470_v11 }
  0x69   : > { %v740_v15 = vsub.f32 %v1218_v5, %v1282_v12  ;;  %v742_v16 = vsub.f32 %v1220_v6, %v1284_v14  ;;  %v1217_v18 = vsel %vm346_vm4, 1.0, %v1404_v17  ;;  %v1219_v19 = vsel %vm348_vm5, 1.0, %v1404_v17 }
  0x6a   : > { %842 = vmatpush1.bf16.msra.mxu0 %v773_v8  ;;  %1325 = vmatpush1.bf16.msra.mxu1 %v773_v8  ;;  %vm547_vm6 = vcmp.eq.s32.totalorder %v244_v45, %v1473_v13  ;;  %vm549_vm7 = vcmp.eq.s32.totalorder %v245_v53, %v1473_v13  ;;  %vm351_vm8 = vcmp.eq.s32.totalorder %v246_v61, %v1466_v9 }
  0x6b   : > { %v776_v20 = vpack.c.bf16 %v742_v16, %v740_v15  ;;  %v1281_v21 = vsel %vm547_vm6, 1.0, %v1404_v17  ;;  %v1283_v22 = vsel %vm549_vm7, 1.0, %v1404_v17  ;;  %vm353_vm9 = vcmp.eq.s32.totalorder %v247_v7, %v1466_v9 }
  0x6c   : > { %v739_v23 = vsub.f32 %v1217_v18, %v1281_v21  ;;  %v741_v24 = vsub.f32 %v1219_v19, %v1283_v22  ;;  %v1222_v25 = vsel %vm351_vm8, 1.0, %v1404_v17  ;;  %v1224_v26 = vsel %vm353_vm9, 1.0, %v1404_v17 }
  0x6d   : > { %843 = vmatprep.subr.bf16.mxu0 %v776_v20  ;;  %1310 = vmatprep.subr.bf16.mxu1 %v776_v20  ;;  %vm552_vm10 = vcmp.eq.s32.totalorder %v246_v61, %v1468_v10  ;;  %vm554_vm11 = vcmp.eq.s32.totalorder %v247_v7, %v1468_v10  ;;  %vm350_vm12 = vcmp.eq.s32.totalorder %v246_v61, %v1470_v11 }
  0x6e   : > { %v775_v27 = vpack.c.bf16 %v741_v24, %v739_v23  ;;  %v1286_v28 = vsel %vm552_vm10, 1.0, %v1404_v17  ;;  %v1288_v29 = vsel %vm554_vm11, 1.0, %v1404_v17  ;;  %vm352_vm13 = vcmp.eq.s32.totalorder %v247_v7, %v1470_v11 }
  0x6f   : > { %v744_v9 = vsub.f32 %v1222_v25, %v1286_v28  ;;  %v746_v30 = vsub.f32 %v1224_v26, %v1288_v29  ;;  %v1221_v31 = vsel %vm350_vm12, 1.0, %v1404_v17  ;;  %v1223_v32 = vsel %vm352_vm13, 1.0, %v1404_v17 }
  0x70   : > { %844 = vmatpush1.bf16.msra.mxu0 %v775_v27  ;;  %1326 = vmatpush1.bf16.msra.mxu1 %v775_v27  ;;  %vm551_vm14 = vcmp.eq.s32.totalorder %v246_v61, %v1473_v13  ;;  %vm553_vm15 = vcmp.eq.s32.totalorder %v247_v7, %v1473_v13 }
  0x71   : > { %v778_v10 = vpack.c.bf16 %v746_v30, %v744_v9  ;;  %v1285_v33 = vsel %vm551_vm14, 1.0, %v1404_v17  ;;  %v1287_v34 = vsel %vm553_vm15, 1.0, %v1404_v17 }
  0x72   : > { %v743_v35 = vsub.f32 %v1221_v31, %v1285_v33  ;;  %v745_v36 = vsub.f32 %v1223_v32, %v1287_v34 }
  0x73   : > { %845 = vmatprep.subr.bf16.mxu0 %v778_v10  ;;  %1311 = vmatprep.subr.bf16.mxu1 %v778_v10 }
  0x74   : > { %v777_v11 = vpack.c.bf16 %v745_v36, %v743_v35 }
  0x76   : > { %846 = vmatpush1.bf16.msra.mxu0 %v777_v11  ;;  %1327 = vmatpush1.bf16.msra.mxu1 %v777_v11 }
  0x79   : > { %848 = vmatmul.mubr.bf16.vlgmr.msra.gmra.mrb[0].mxu0 %v1358_v37  ;;  %858 = vmatmul.mubr.bf16.vlgmr.msra.gmra.mrb[0].mxu1 %v1361_v38 }
 0x14c   : > { %v849_v13 = vpop.f32.mrb[0].mxu0  ;;  %v859_v39 = vpop.f32.mrb[0].mxu1 }
 0x14d   : > { %v895_v17 = vadd.f32 %v859_v39, %v849_v13  ;;  %v851_v40 = vpop.f32.mrb[1].mxu0  ;;  %v861_v41 = vpop.f32.mrb[1].mxu1 }
 0x14e   : > { %v896_v42 = vadd.f32 %v861_v41, %v851_v40  ;;  %v853_v43 = vpop.f32.mrb[2].mxu0  ;;  %v863_v44 = vpop.f32.mrb[2].mxu1 }
 0x14f   : > { %v899_v45 = vmul.f32 %v895_v17, %v895_v17  ;;  %v897_v46 = vadd.f32 %v863_v44, %v853_v43  ;;  %v855_v47 = vpop.f32.mrb[3].mxu0  ;;  %v865_v48 = vpop.f32.mrb[3].mxu1 }
 0x150   : > { %v900_v49 = vmul.f32 %v896_v42, %v896_v42  ;;  %v898_v50 = vadd.f32 %v865_v48, %v855_v47 }
 0x151   : > { %v904_v51 = vsel %vm903_vm0, %v899_v45, 0.0  ;;  %v989_v52 = vrot.slane %v899_v45, 4  ;;  %v901_v53 = vmul.f32 %v897_v46, %v897_v46 }
 0x152   : > { %v905_v54 = vrot.slane %v904_v51, 4  ;;  %v911_v55 = vsel %vm903_vm0, %v900_v49, 0.0  ;;  %v990_v56 = vrot.slane %v900_v49, 4  ;;  %v902_v57 = vmul.f32 %v898_v50, %v898_v50 }
 0x153   : > { %v993_v58 = vsel %vm903_vm0, %v989_v52, 0.0  ;;  %v912_v59 = vrot.slane %v911_v55, 4  ;;  %v918_v60 = vsel %vm903_vm0, %v901_v53, 0.0  ;;  %v1009_v61 = vrot.slane %v901_v53, 4 }
 0x154   : > { %v906_v62 = vadd.f32 %v905_v54, %v904_v51  ;;  %v994_v63 = vrot.slane %v993_v58, 4  ;;  %v1000_v1 = vsel %vm903_vm0, %v990_v56, 0.0  ;;  %v919_v3 = vrot.slane %v918_v60, 4 }
 0x155   : > { %v913_v4 = vadd.f32 %v912_v59, %v911_v55  ;;  %v1001_v5 = vrot.slane %v1000_v1, 4  ;;  %v1013_v6 = vsel %vm903_vm0, %v1009_v61, 0.0  ;;  %v925_v7 = vsel %vm903_vm0, %v902_v57, 0.0 }
 0x156   : > { %v907_v8 = vrot.slane %v906_v62, 2  ;;  %v995_v12 = vadd.f32 %v994_v63, %v993_v58  ;;  %v920_v14 = vadd.f32 %v919_v3, %v918_v60  ;;  %v1014_v15 = vrot.slane %v1013_v6, 4 }
 0x157   : > { %v914_v16 = vrot.slane %v913_v4, 2  ;;  %v1002_v18 = vadd.f32 %v1001_v5, %v1000_v1  ;;  %v926_v19 = vrot.slane %v925_v7, 4  ;;  %v1010_v20 = vrot.slane %v902_v57, 4 }
 0x158   : > { %v908_v21 = vadd.f32 %v907_v8, %v906_v62  ;;  %v996_v22 = vrot.slane %v995_v12, 2  ;;  %v921_v23 = vrot.slane %v920_v14, 2  ;;  %v1015_v24 = vadd.f32 %v1014_v15, %v1013_v6 }
 0x159   : > { %v915_v25 = vadd.f32 %v914_v16, %v913_v4  ;;  %v1003_v26 = vrot.slane %v1002_v18, 2  ;;  %v927_v27 = vadd.f32 %v926_v19, %v925_v7  ;;  %v1020_v28 = vsel %vm903_vm0, %v1010_v20, 0.0 }
 0x15a   : > { %v909_v29 = vrot.slane %v908_v21, 1  ;;  %v997_v9 = vadd.f32 %v996_v22, %v995_v12  ;;  %v922_v30 = vadd.f32 %v921_v23, %v920_v14  ;;  %v1016_v31 = vrot.slane %v1015_v24, 2 }
 0x15b   : > { %v916_v32 = vrot.slane %v915_v25, 1  ;;  %v1004_v10 = vadd.f32 %v1003_v26, %v1002_v18  ;;  %v928_v33 = vrot.slane %v927_v27, 2  ;;  %v1021_v34 = vrot.slane %v1020_v28, 4 }
 0x15c   : > { %v910_v35 = vadd.f32 %v909_v29, %v908_v21  ;;  %v998_v36 = vrot.slane %v997_v9, 1  ;;  %v923_v11 = vrot.slane %v922_v30, 1  ;;  %v1017_v37 = vadd.f32 %v1016_v31, %v1015_v24 }
 0x15d   : > { %v1790_v38 = vadd.f32 %v916_v32, %v915_v25  ;;  %v1005_v39 = vrot.slane %v1004_v10, 1  ;;  %v929_v41 = vadd.f32 %v928_v33, %v927_v27  ;;  %v1022_v42 = vadd.f32 %v1021_v34, %v1020_v28 }
 0x15e   : > { %1364 = vrsqrt.f32 %v910_v35  ;;  %v999_v13 = vadd.f32 %v998_v36, %v997_v9  ;;  %v924_v17 = vadd.f32 %v923_v11, %v922_v30  ;;  %v1018_v40 = vrot.slane %v1017_v37, 1 }
 0x15f   : > { %v1793_v43 = vadd.f32 %v1005_v39, %v1004_v10  ;;  %v930_v45 = vrot.slane %v929_v41, 1  ;;  %v1023_v46 = vrot.slane %v1022_v42, 2  ;;  %v1405_v50 = vmov 1966171168  }
 0x160   : > { %1366 = vrsqrt.f32 %v999_v13  ;;  %v1019_v44 = vadd.f32 %v1018_v40, %v1017_v37  ;;  %v968_v51 = vunpack.c.l.s4 %v1405_v50  ;;  %vm934_vm1 = vcmp.eq.f32.partialorder %v910_v35, inf }
 0x161   : > { %1368 = vrsqrt.f32 %v1790_v38  ;;  %v931_v47 = vadd.f32 %v930_v45, %v929_v41  ;;  %v1024_v48 = vadd.f32 %v1023_v46, %v1022_v42  ;;  %vm936_vm2 = vcmp.eq.f32.partialorder %v910_v35, 0.0 }
 0x162   : > { %1370 = vrsqrt.f32 %v924_v17  ;;  %v969_v59 = vunpack.c.0.s8 %v968_v51  ;;  %v937_v62 = vand.u32 2147483648, %v910_v35  ;;  %vm941_vm3 = vcmp.eq.f32.partialorder %v1790_v38, inf }
 0x163   : > { %1372 = vrsqrt.f32 %v1019_v44  ;;  %v1025_v53 = vrot.slane %v1024_v48, 1  ;;  %vm948_vm4 = vcmp.eq.f32.partialorder %v924_v17, inf  ;;  %v951_v63 = vand.u32 2147483648, %v924_v17 }
 0x164   : > { %1374 = vrsqrt.f32 %v1793_v43  ;;  %vm1029_vm5 = vcmp.eq.f32.partialorder %v999_v13, inf  ;;  %vm950_vm6 = vcmp.eq.f32.partialorder %v924_v17, 0.0  ;;  %v1032_v14 = vand.u32 2147483648, %v999_v13 }
 0x165   : > { %1376 = vrsqrt.f32 %v931_v47  ;;  %v1796_v56 = vadd.f32 %v1025_v53, %v1024_v48  ;;  %vm1043_vm7 = vcmp.eq.f32.partialorder %v1019_v44, inf  ;;  %v1046_v16 = vand.u32 2147483648, %v1019_v44 }
 0x166   : > { %vm1031_vm8 = vcmp.eq.f32.partialorder %v999_v13, 0.0  ;;  %v944_v19 = vand.u32 2147483648, %v1790_v38  ;;  %vm1045_vm9 = vcmp.eq.f32.partialorder %v1019_v44, 0.0  ;;  %vm955_vm10 = vcmp.eq.f32.partialorder %v931_v47, inf }
 0x167   : > { %1378 = vrsqrt.f32 %v1796_v56  ;;  %v958_v27 = vand.u32 2147483648, %v931_v47  ;;  %vm943_vm11 = vcmp.eq.f32.partialorder %v1790_v38, 0.0  ;;  %vm957_vm12 = vcmp.eq.f32.partialorder %v931_v47, 0.0 }
 0x168   : > { %v1365_v49 = vpop.eup %1364  ;;  %vm1036_vm13 = vcmp.eq.f32.partialorder %v1793_v43, inf  ;;  %v972_v33 = vsub.s32 %v969_v59, %v1448_v2  ;;  %vm1050_vm14 = vcmp.eq.f32.partialorder %v1796_v56, inf  ;;  %v1053_v11 = vand.u32 2147483648, %v1796_v56 }
 0x169   : > { %v933_v52 = vmul.f32 %v1365_v49, %v910_v35  ;;  %vm1038_vm15 = vcmp.eq.f32.partialorder %v1793_v43, 0.0  ;;  %vm1052_vm0 = vcmp.eq.f32.partialorder %v1796_v56, 0.0 }
 0x16a   : > { %v1367_v54 = vpop.eup %1366 }
 0x16b   : > { %v1369_v55 = vpop.eup %1368  ;;  %v1028_v58 = vmul.f32 %v1367_v54, %v999_v13  ;;  %v935_v60 = vsel %vm934_vm1, %v910_v35, %v933_v52  ;;  %v1039_v35 = vand.u32 2147483648, %v1793_v43  ;;  %vm984_vm1 = vcmp.lt.s32.totalorder %v215_v0, 256 }
 0x16c   : > { %v1371_v57 = vpop.eup %1370  ;;  %v940_v3 = vmul.f32 %v1369_v55, %v1790_v38  ;;  %v938_v5 = vsel %vm936_vm2, %v937_v62, %v935_v60 }
 0x16d   : > { %v947_v61 = vmul.f32 %v1371_v57, %v924_v17  ;;  %v1373_v1 = vpop.eup %1372  ;;  %v1030_v6 = vsel %vm1029_vm5, %v999_v13, %v1028_v58 }
 0x16e   : > { %v1042_v8 = vmul.f32 %v1373_v1, %v1019_v44  ;;  %v1375_v12 = vpop.eup %1374  ;;  %v1033_v21 = vsel %vm1031_vm8, %v1032_v14, %v1030_v6  ;;  %v942_v22 = vsel %vm941_vm3, %v1790_v38, %v940_v3 }
 0x16f   : > { %v949_v4 = vsel %vm948_vm4, %v924_v17, %v947_v61  ;;  %v1377_v18 = vpop.eup %1376  ;;  %v1035_v25 = vmul.f32 %v1375_v12, %v1793_v43  ;;  %v945_v29 = vsel %vm943_vm11, %v944_v19, %v942_v22 }
 0x170   : > { %v952_v7 = vsel %vm950_vm6, %v951_v63, %v949_v4  ;;  %v1044_v20 = vsel %vm1043_vm7, %v1019_v44, %v1042_v8  ;;  %v954_v24 = vmul.f32 %v1377_v18, %v931_v47 }
 0x171   : > { %v960_v15 = vsub.f32 %v938_v5, %v952_v7  ;;  %v1047_v23 = vsel %vm1045_vm9, %v1046_v16, %v1044_v20  ;;  %v1379_v30 = vpop.eup %1378  ;;  %v1037_v10 = vsel %vm1036_vm13, %v1793_v43, %v1035_v25 }
 0x172   : > { %v1055_v26 = vsub.f32 %v1033_v21, %v1047_v23  ;;  %v956_v28 = vsel %vm955_vm10, %v931_v47, %v954_v24  ;;  %v1049_v34 = vmul.f32 %v1379_v30, %v1796_v56  ;;  %v1040_v38 = vsel %vm1038_vm15, %v1039_v35, %v1037_v10 }
 0x173   : > { %v959_v9 = vsel %vm957_vm12, %v958_v27, %v956_v28  ;;  %v962_v31 = vand.u32 2147483647, %v960_v15 }
 0x174   : > { %v961_v32 = vsub.f32 %v945_v29, %v959_v9  ;;  %v1051_v37 = vsel %vm1050_vm14, %v1796_v56, %v1049_v34  ;;  %v1057_v2 = vand.u32 2147483647, %v1055_v26 }
 0x175   : > { %v1054_v39 = vsel %vm1052_vm0, %v1053_v11, %v1051_v37 }
 0x176   : > { %v963_v36 = vand.u32 2147483647, %v961_v32  ;;  %v1056_v17 = vsub.f32 %v1040_v38, %v1054_v39 }
 0x178   : > { %v966_v13 = vcombine.low %v962_v31, %v963_v36  ;;  %v1058_v41 = vand.u32 2147483647, %v1056_v17 }
 0x17a   : > { %v973_v40 = vrot.slane %v966_v13, %v972_v33  ;;  %v1061_v43 = vcombine.low %v1057_v2, %v1058_v41 }
 0x17c   : > { %v980_v42 = vrot.slane %v973_v40, %v972_v33  ;;  %v1068_v44 = vrot.slane %v1061_v43, %v972_v33 }
 0x17e   : > { %986 = vst.msk [vmem:[%s200_s7] ss:$2 sm:$0x3] %vm984_vm1, %v980_v42  ;;  %v1075_v45 = vrot.slane %v1068_v44, %v972_v33 }
 0x180   : > { %1293 = vst.msk [vmem:[%s200_s7 + $0x1] ss:$2 sm:$0x3] %vm984_vm1, %v1075_v45 }
 0x181 PF: > { %s13_s14 = sadd.s32 1, %s1402_s14   ;;  %s1835_s12 = smov %s1398_s13 }
 0x182   : > { %p10_p5 = scmp.ge.s32.totalorder %s13_s14, 4   ;;  %s1836_s13 = smov %s1838_s15 }
 0x184   :  { %12 = sbr.rel (!%p10_p5) target bundleno = 2 (0x2), region = 75 }

</bundles_post_ra>
